<compile_context>
chip_gen: v7x
topology: tpu7x:2x2x1
jax: 0.10.0
libtpu: 0.0.40
codegen_flags: <defaults>
</compile_context>

<pallas_src>
import functools

import jax
import jax.numpy as jnp
from jax.experimental import pallas as pl
from jax.experimental.pallas import tpu as pltpu


def _image_to_patches_kernel(x_ref, o_ref, *, patch_size, C, Hp, Wp):
    """x_ref: (B, C, H, W); o_ref: (B, Hp, Wp, C*P, P) (contiguous view of (B,T,N))."""
    P = patch_size
    x = x_ref[...]                                          # (B, C, H, W)
    for hp in range(Hp):
        # Patch-row group hp for all batches/channels: (B, C, P, W).
        xg = x[:, :, hp * P:(hp + 1) * P, :]
        # Channel-stack into the sublane dim; rows ordered (c, i):
        #   y[b, c*P+i, w] = x[b, c, hp*P+i, w]
        y = jnp.concatenate([xg[:, c] for c in range(C)], axis=1)      # (B, C*P, W)
        # Split the lane dim into Wp groups of width P; wp becomes a major axis:
        #   z[b, wp, c*P+i, j] = x[b, c, hp*P+i, wp*P+j]
        z = jnp.stack([y[:, :, wp * P:(wp + 1) * P] for wp in range(Wp)],
                      axis=1)                                          # (B, Wp, C*P, P)
        o_ref[:, hp] = z


def image_to_patches(x, patch_size):
    """Pallas equivalent of ImageToPatches.forward: [B,C,H,W] -> [B,T,C*P*P]."""
    B, C, H, W = x.shape
    P = patch_size
    assert H % P == 0 and W % P == 0, "H and W must be divisible by patch_size"
    Hp, Wp = H // P, W // P
    T, N = Hp * Wp, C * P * P

    nbytes = x.size * x.dtype.itemsize
    out6 = pl.pallas_call(
        functools.partial(_image_to_patches_kernel,
                          patch_size=P, C=C, Hp=Hp, Wp=Wp),
        out_shape=jax.ShapeDtypeStruct((B, Hp, Wp, C * P, P), x.dtype),
        grid=(1,),                                    # single program, whole batch
        in_specs=[pl.BlockSpec((B, C, H, W), lambda i: (0, 0, 0, 0))],
        out_specs=pl.BlockSpec((B, Hp, Wp, C * P, P),
                               lambda i: (0, 0, 0, 0, 0)),
        compiler_params=pltpu.CompilerParams(
            dimension_semantics=("arbitrary",)),
        cost_estimate=pl.CostEstimate(
            flops=0, transcendentals=0, bytes_accessed=2 * nbytes),
    )(x)
    # (B, Hp, Wp, C*P, P) -> (B, T, N): contiguous row-major reshape, zero-cost,
    # preserves exactness (no transpose).
    return out6.reshape(B, T, N)


# ---------------------------------------------------------------------------
# pure-JAX reference (mirrors the PyTorch module exactly)
# ---------------------------------------------------------------------------
def ref_image_to_patches(x, patch_size):
    P = patch_size
    B, C, H, W = x.shape
    x = x.reshape(B, C, H // P, P, W // P, P)
    x = x.transpose(0, 2, 4, 1, 3, 5)
    return x.reshape(B, (H // P) * (W // P), C * P * P)


# ---------------------------------------------------------------------------
if __name__ == "__main__":
    key = jax.random.PRNGKey(0)

    B, C, H, W, P = 2, 4, 16, 16, 4
    x = jax.random.normal(key, (B, C, H, W), jnp.float32)

    out = jax.block_until_ready(image_to_patches(x, P))

    ref = ref_image_to_patches(x, P)
    assert out.shape == (B, (H // P) * (W // P), C * P * P)
    assert bool(jnp.all(jnp.isfinite(out)))
    assert bool(jnp.all(out == ref))   # pure data movement -> exact match

    print("KERNEL_OK")
</pallas_src>

<mosaic_0001>
module attributes {stable_mosaic.version = 11 : i64} {
  func.func @_image_to_patches_kernel(%arg0: i32, %arg1: memref<2x4x16x16xf32, #tpu.memory_space<vmem>>, %arg2: memref<2x4x4x16x4xf32, #tpu.memory_space<vmem>>) attributes {dimension_semantics = [#tpu.dimension_semantics<arbitrary>], iteration_bounds = array<i64: 1>, scalar_prefetch = 0 : i64, scratch_operands = 0 : i64, tpu.core_type = #tpu.core_type<tc>, window_params = [{pipeline_mode = #tpu.pipeline_mode<synchronous>, transform_indices = @transform_0, window_bounds = array<i64: 2, 4, 16, 16>}, {pipeline_mode = #tpu.pipeline_mode<synchronous>, transform_indices = @transform_1, window_bounds = array<i64: 2, 4, 4, 16, 4>}]} {
    %c0 = arith.constant 0 : index
    %c0_0 = arith.constant 0 : index
    %c0_1 = arith.constant 0 : index
    %c0_2 = arith.constant 0 : index
    %0 = vector.load %arg1[%c0, %c0_0, %c0_1, %c0_2] : memref<2x4x16x16xf32, #tpu.memory_space<vmem>>, vector<2x4x16x16xf32>
    %1 = vector.extract_strided_slice %0 {offsets = [0, 0, 0, 0], sizes = [2, 4, 4, 16], strides = [1, 1, 1, 1]} : vector<2x4x16x16xf32> to vector<2x4x4x16xf32>
    %2 = vector.extract_strided_slice %1 {offsets = [0, 0, 0, 0], sizes = [2, 1, 4, 16], strides = [1, 1, 1, 1]} : vector<2x4x4x16xf32> to vector<2x1x4x16xf32>
    %3 = vector.shape_cast %2 : vector<2x1x4x16xf32> to vector<2x4x16xf32>
    %4 = vector.extract_strided_slice %1 {offsets = [0, 1, 0, 0], sizes = [2, 1, 4, 16], strides = [1, 1, 1, 1]} : vector<2x4x4x16xf32> to vector<2x1x4x16xf32>
    %5 = vector.shape_cast %4 : vector<2x1x4x16xf32> to vector<2x4x16xf32>
    %6 = vector.extract_strided_slice %1 {offsets = [0, 2, 0, 0], sizes = [2, 1, 4, 16], strides = [1, 1, 1, 1]} : vector<2x4x4x16xf32> to vector<2x1x4x16xf32>
    %7 = vector.shape_cast %6 : vector<2x1x4x16xf32> to vector<2x4x16xf32>
    %8 = vector.extract_strided_slice %1 {offsets = [0, 3, 0, 0], sizes = [2, 1, 4, 16], strides = [1, 1, 1, 1]} : vector<2x4x4x16xf32> to vector<2x1x4x16xf32>
    %9 = vector.shape_cast %8 : vector<2x1x4x16xf32> to vector<2x4x16xf32>
    %10 = tpu.concatenate %3, %5, %7, %9 in 1 : vector<2x4x16xf32>, vector<2x4x16xf32>, vector<2x4x16xf32>, vector<2x4x16xf32> -> vector<2x16x16xf32>
    %11 = vector.extract_strided_slice %10 {offsets = [0, 0, 0], sizes = [2, 16, 4], strides = [1, 1, 1]} : vector<2x16x16xf32> to vector<2x16x4xf32>
    %12 = vector.extract_strided_slice %10 {offsets = [0, 0, 4], sizes = [2, 16, 4], strides = [1, 1, 1]} : vector<2x16x16xf32> to vector<2x16x4xf32>
    %13 = vector.extract_strided_slice %10 {offsets = [0, 0, 8], sizes = [2, 16, 4], strides = [1, 1, 1]} : vector<2x16x16xf32> to vector<2x16x4xf32>
    %14 = vector.extract_strided_slice %10 {offsets = [0, 0, 12], sizes = [2, 16, 4], strides = [1, 1, 1]} : vector<2x16x16xf32> to vector<2x16x4xf32>
    %15 = vector.shape_cast %11 : vector<2x16x4xf32> to vector<2x1x16x4xf32>
    %16 = vector.shape_cast %12 : vector<2x16x4xf32> to vector<2x1x16x4xf32>
    %17 = vector.shape_cast %13 : vector<2x16x4xf32> to vector<2x1x16x4xf32>
    %18 = vector.shape_cast %14 : vector<2x16x4xf32> to vector<2x1x16x4xf32>
    %19 = tpu.concatenate %15, %16, %17, %18 in 1 : vector<2x1x16x4xf32>, vector<2x1x16x4xf32>, vector<2x1x16x4xf32>, vector<2x1x16x4xf32> -> vector<2x4x16x4xf32>
    %c0_3 = arith.constant 0 : index
    %c0_4 = arith.constant 0 : index
    %c0_5 = arith.constant 0 : index
    %c0_6 = arith.constant 0 : index
    %c0_7 = arith.constant 0 : index
    %20 = vector.load %arg2[%c0_3, %c0_4, %c0_5, %c0_6, %c0_7] : memref<2x4x4x16x4xf32, #tpu.memory_space<vmem>>, vector<2x1x4x16x4xf32>
    %21 = vector.shape_cast %20 : vector<2x1x4x16x4xf32> to vector<2x4x16x4xf32>
    %22 = vector.shape_cast %19 : vector<2x4x16x4xf32> to vector<2x1x4x16x4xf32>
    tpu.vector_store %arg2[%c0_3, %c0_4, %c0_5, %c0_6, %c0_7], %22 {strides = array<i32>} : memref<2x4x4x16x4xf32, #tpu.memory_space<vmem>>, vector<2x1x4x16x4xf32>,
    %23 = vector.extract_strided_slice %0 {offsets = [0, 0, 4, 0], sizes = [2, 4, 4, 16], strides = [1, 1, 1, 1]} : vector<2x4x16x16xf32> to vector<2x4x4x16xf32>
    %24 = vector.extract_strided_slice %23 {offsets = [0, 0, 0, 0], sizes = [2, 1, 4, 16], strides = [1, 1, 1, 1]} : vector<2x4x4x16xf32> to vector<2x1x4x16xf32>
    %25 = vector.shape_cast %24 : vector<2x1x4x16xf32> to vector<2x4x16xf32>
    %26 = vector.extract_strided_slice %23 {offsets = [0, 1, 0, 0], sizes = [2, 1, 4, 16], strides = [1, 1, 1, 1]} : vector<2x4x4x16xf32> to vector<2x1x4x16xf32>
    %27 = vector.shape_cast %26 : vector<2x1x4x16xf32> to vector<2x4x16xf32>
    %28 = vector.extract_strided_slice %23 {offsets = [0, 2, 0, 0], sizes = [2, 1, 4, 16], strides = [1, 1, 1, 1]} : vector<2x4x4x16xf32> to vector<2x1x4x16xf32>
    %29 = vector.shape_cast %28 : vector<2x1x4x16xf32> to vector<2x4x16xf32>
    %30 = vector.extract_strided_slice %23 {offsets = [0, 3, 0, 0], sizes = [2, 1, 4, 16], strides = [1, 1, 1, 1]} : vector<2x4x4x16xf32> to vector<2x1x4x16xf32>
    %31 = vector.shape_cast %30 : vector<2x1x4x16xf32> to vector<2x4x16xf32>
    %32 = tpu.concatenate %25, %27, %29, %31 in 1 : vector<2x4x16xf32>, vector<2x4x16xf32>, vector<2x4x16xf32>, vector<2x4x16xf32> -> vector<2x16x16xf32>
    %33 = vector.extract_strided_slice %32 {offsets = [0, 0, 0], sizes = [2, 16, 4], strides = [1, 1, 1]} : vector<2x16x16xf32> to vector<2x16x4xf32>
    %34 = vector.extract_strided_slice %32 {offsets = [0, 0, 4], sizes = [2, 16, 4], strides = [1, 1, 1]} : vector<2x16x16xf32> to vector<2x16x4xf32>
    %35 = vector.extract_strided_slice %32 {offsets = [0, 0, 8], sizes = [2, 16, 4], strides = [1, 1, 1]} : vector<2x16x16xf32> to vector<2x16x4xf32>
    %36 = vector.extract_strided_slice %32 {offsets = [0, 0, 12], sizes = [2, 16, 4], strides = [1, 1, 1]} : vector<2x16x16xf32> to vector<2x16x4xf32>
    %37 = vector.shape_cast %33 : vector<2x16x4xf32> to vector<2x1x16x4xf32>
    %38 = vector.shape_cast %34 : vector<2x16x4xf32> to vector<2x1x16x4xf32>
    %39 = vector.shape_cast %35 : vector<2x16x4xf32> to vector<2x1x16x4xf32>
    %40 = vector.shape_cast %36 : vector<2x16x4xf32> to vector<2x1x16x4xf32>
    %41 = tpu.concatenate %37, %38, %39, %40 in 1 : vector<2x1x16x4xf32>, vector<2x1x16x4xf32>, vector<2x1x16x4xf32>, vector<2x1x16x4xf32> -> vector<2x4x16x4xf32>
    %c0_8 = arith.constant 0 : index
    %c1 = arith.constant 1 : index
    %c0_9 = arith.constant 0 : index
    %c0_10 = arith.constant 0 : index
    %c0_11 = arith.constant 0 : index
    %42 = vector.load %arg2[%c0_8, %c1, %c0_9, %c0_10, %c0_11] : memref<2x4x4x16x4xf32, #tpu.memory_space<vmem>>, vector<2x1x4x16x4xf32>
    %43 = vector.shape_cast %42 : vector<2x1x4x16x4xf32> to vector<2x4x16x4xf32>
    %44 = vector.shape_cast %41 : vector<2x4x16x4xf32> to vector<2x1x4x16x4xf32>
    tpu.vector_store %arg2[%c0_8, %c1, %c0_9, %c0_10, %c0_11], %44 {strides = array<i32>} : memref<2x4x4x16x4xf32, #tpu.memory_space<vmem>>, vector<2x1x4x16x4xf32>,
    %45 = vector.extract_strided_slice %0 {offsets = [0, 0, 8, 0], sizes = [2, 4, 4, 16], strides = [1, 1, 1, 1]} : vector<2x4x16x16xf32> to vector<2x4x4x16xf32>
    %46 = vector.extract_strided_slice %45 {offsets = [0, 0, 0, 0], sizes = [2, 1, 4, 16], strides = [1, 1, 1, 1]} : vector<2x4x4x16xf32> to vector<2x1x4x16xf32>
    %47 = vector.shape_cast %46 : vector<2x1x4x16xf32> to vector<2x4x16xf32>
    %48 = vector.extract_strided_slice %45 {offsets = [0, 1, 0, 0], sizes = [2, 1, 4, 16], strides = [1, 1, 1, 1]} : vector<2x4x4x16xf32> to vector<2x1x4x16xf32>
    %49 = vector.shape_cast %48 : vector<2x1x4x16xf32> to vector<2x4x16xf32>
    %50 = vector.extract_strided_slice %45 {offsets = [0, 2, 0, 0], sizes = [2, 1, 4, 16], strides = [1, 1, 1, 1]} : vector<2x4x4x16xf32> to vector<2x1x4x16xf32>
    %51 = vector.shape_cast %50 : vector<2x1x4x16xf32> to vector<2x4x16xf32>
    %52 = vector.extract_strided_slice %45 {offsets = [0, 3, 0, 0], sizes = [2, 1, 4, 16], strides = [1, 1, 1, 1]} : vector<2x4x4x16xf32> to vector<2x1x4x16xf32>
    %53 = vector.shape_cast %52 : vector<2x1x4x16xf32> to vector<2x4x16xf32>
    %54 = tpu.concatenate %47, %49, %51, %53 in 1 : vector<2x4x16xf32>, vector<2x4x16xf32>, vector<2x4x16xf32>, vector<2x4x16xf32> -> vector<2x16x16xf32>
    %55 = vector.extract_strided_slice %54 {offsets = [0, 0, 0], sizes = [2, 16, 4], strides = [1, 1, 1]} : vector<2x16x16xf32> to vector<2x16x4xf32>
    %56 = vector.extract_strided_slice %54 {offsets = [0, 0, 4], sizes = [2, 16, 4], strides = [1, 1, 1]} : vector<2x16x16xf32> to vector<2x16x4xf32>
    %57 = vector.extract_strided_slice %54 {offsets = [0, 0, 8], sizes = [2, 16, 4], strides = [1, 1, 1]} : vector<2x16x16xf32> to vector<2x16x4xf32>
    %58 = vector.extract_strided_slice %54 {offsets = [0, 0, 12], sizes = [2, 16, 4], strides = [1, 1, 1]} : vector<2x16x16xf32> to vector<2x16x4xf32>
    %59 = vector.shape_cast %55 : vector<2x16x4xf32> to vector<2x1x16x4xf32>
    %60 = vector.shape_cast %56 : vector<2x16x4xf32> to vector<2x1x16x4xf32>
    %61 = vector.shape_cast %57 : vector<2x16x4xf32> to vector<2x1x16x4xf32>
    %62 = vector.shape_cast %58 : vector<2x16x4xf32> to vector<2x1x16x4xf32>
    %63 = tpu.concatenate %59, %60, %61, %62 in 1 : vector<2x1x16x4xf32>, vector<2x1x16x4xf32>, vector<2x1x16x4xf32>, vector<2x1x16x4xf32> -> vector<2x4x16x4xf32>
    %c0_12 = arith.constant 0 : index
    %c2 = arith.constant 2 : index
    %c0_13 = arith.constant 0 : index
    %c0_14 = arith.constant 0 : index
    %c0_15 = arith.constant 0 : index
    %64 = vector.load %arg2[%c0_12, %c2, %c0_13, %c0_14, %c0_15] : memref<2x4x4x16x4xf32, #tpu.memory_space<vmem>>, vector<2x1x4x16x4xf32>
    %65 = vector.shape_cast %64 : vector<2x1x4x16x4xf32> to vector<2x4x16x4xf32>
    %66 = vector.shape_cast %63 : vector<2x4x16x4xf32> to vector<2x1x4x16x4xf32>
    tpu.vector_store %arg2[%c0_12, %c2, %c0_13, %c0_14, %c0_15], %66 {strides = array<i32>} : memref<2x4x4x16x4xf32, #tpu.memory_space<vmem>>, vector<2x1x4x16x4xf32>,
    %67 = vector.extract_strided_slice %0 {offsets = [0, 0, 12, 0], sizes = [2, 4, 4, 16], strides = [1, 1, 1, 1]} : vector<2x4x16x16xf32> to vector<2x4x4x16xf32>
    %68 = vector.extract_strided_slice %67 {offsets = [0, 0, 0, 0], sizes = [2, 1, 4, 16], strides = [1, 1, 1, 1]} : vector<2x4x4x16xf32> to vector<2x1x4x16xf32>
    %69 = vector.shape_cast %68 : vector<2x1x4x16xf32> to vector<2x4x16xf32>
    %70 = vector.extract_strided_slice %67 {offsets = [0, 1, 0, 0], sizes = [2, 1, 4, 16], strides = [1, 1, 1, 1]} : vector<2x4x4x16xf32> to vector<2x1x4x16xf32>
    %71 = vector.shape_cast %70 : vector<2x1x4x16xf32> to vector<2x4x16xf32>
    %72 = vector.extract_strided_slice %67 {offsets = [0, 2, 0, 0], sizes = [2, 1, 4, 16], strides = [1, 1, 1, 1]} : vector<2x4x4x16xf32> to vector<2x1x4x16xf32>
    %73 = vector.shape_cast %72 : vector<2x1x4x16xf32> to vector<2x4x16xf32>
    %74 = vector.extract_strided_slice %67 {offsets = [0, 3, 0, 0], sizes = [2, 1, 4, 16], strides = [1, 1, 1, 1]} : vector<2x4x4x16xf32> to vector<2x1x4x16xf32>
    %75 = vector.shape_cast %74 : vector<2x1x4x16xf32> to vector<2x4x16xf32>
    %76 = tpu.concatenate %69, %71, %73, %75 in 1 : vector<2x4x16xf32>, vector<2x4x16xf32>, vector<2x4x16xf32>, vector<2x4x16xf32> -> vector<2x16x16xf32>
    %77 = vector.extract_strided_slice %76 {offsets = [0, 0, 0], sizes = [2, 16, 4], strides = [1, 1, 1]} : vector<2x16x16xf32> to vector<2x16x4xf32>
    %78 = vector.extract_strided_slice %76 {offsets = [0, 0, 4], sizes = [2, 16, 4], strides = [1, 1, 1]} : vector<2x16x16xf32> to vector<2x16x4xf32>
    %79 = vector.extract_strided_slice %76 {offsets = [0, 0, 8], sizes = [2, 16, 4], strides = [1, 1, 1]} : vector<2x16x16xf32> to vector<2x16x4xf32>
    %80 = vector.extract_strided_slice %76 {offsets = [0, 0, 12], sizes = [2, 16, 4], strides = [1, 1, 1]} : vector<2x16x16xf32> to vector<2x16x4xf32>
    %81 = vector.shape_cast %77 : vector<2x16x4xf32> to vector<2x1x16x4xf32>
    %82 = vector.shape_cast %78 : vector<2x16x4xf32> to vector<2x1x16x4xf32>
    %83 = vector.shape_cast %79 : vector<2x16x4xf32> to vector<2x1x16x4xf32>
    %84 = vector.shape_cast %80 : vector<2x16x4xf32> to vector<2x1x16x4xf32>
    %85 = tpu.concatenate %81, %82, %83, %84 in 1 : vector<2x1x16x4xf32>, vector<2x1x16x4xf32>, vector<2x1x16x4xf32>, vector<2x1x16x4xf32> -> vector<2x4x16x4xf32>
    %c0_16 = arith.constant 0 : index
    %c3 = arith.constant 3 : index
    %c0_17 = arith.constant 0 : index
    %c0_18 = arith.constant 0 : index
    %c0_19 = arith.constant 0 : index
    %86 = vector.load %arg2[%c0_16, %c3, %c0_17, %c0_18, %c0_19] : memref<2x4x4x16x4xf32, #tpu.memory_space<vmem>>, vector<2x1x4x16x4xf32>
    %87 = vector.shape_cast %86 : vector<2x1x4x16x4xf32> to vector<2x4x16x4xf32>
    %88 = vector.shape_cast %85 : vector<2x4x16x4xf32> to vector<2x1x4x16x4xf32>
    tpu.vector_store %arg2[%c0_16, %c3, %c0_17, %c0_18, %c0_19], %88 {strides = array<i32>} : memref<2x4x4x16x4xf32, #tpu.memory_space<vmem>>, vector<2x1x4x16x4xf32>,
    return
  }
  func.func @transform_0(%arg0: i32) -> (i32, i32, i32, i32) {
    %c0_i32 = arith.constant 0 : i32
    %c0_i32_0 = arith.constant 0 : i32
    %c0_i32_1 = arith.constant 0 : i32
    %c0_i32_2 = arith.constant 0 : i32
    %c0_i32_3 = arith.constant 0 : i32
    return %c0_i32, %c0_i32_0, %c0_i32_1, %c0_i32_2 : i32, i32, i32, i32
  }
  func.func @transform_1(%arg0: i32) -> (i32, i32, i32, i32, i32) {
    %c0_i32 = arith.constant 0 : i32
    %c0_i32_0 = arith.constant 0 : i32
    %c0_i32_1 = arith.constant 0 : i32
    %c0_i32_2 = arith.constant 0 : i32
    %c0_i32_3 = arith.constant 0 : i32
    %c0_i32_4 = arith.constant 0 : i32
    return %c0_i32, %c0_i32_0, %c0_i32_1, %c0_i32_2, %c0_i32_3 : i32, i32, i32, i32, i32
  }
}

</mosaic_0001>

<bundles_post_ra>
// kernel: tpu_custom_call.1
= control target key start
LH: loop header
LB: loop body
LE: loop exit
PB: predicated region body
PF: predicated region fallthrough
CT: control target
= control target key end

     0   :  { %6 = vsyncpa [#allocation3], 0  ;;  %s414_s6 = smov [#allocation2]   ;;  %s774_s0 = inlined_call_operand.hbm [shape: f32[2,4,16,16], index: 0, kind: input, shape index: {}]   ;;  %s775_s1 = inlined_call_operand.vmem [shape: f32[2,4,4,16,4], index: 1, kind: output, shape index: {}]  }
   0x1   :  { %s12_s7 = sshll.u32 %s414_s6, 4  ;;  %s390_s10 = scalar_lea.hbm %s774_s0, 2048  ;;  %s13_s7 = int_to_ptr.vmem [resolvable:$true] %s12_s7 }
   0x2   :  { %p391_p0 = scmp.ne.s32.totalorder %s774_s0, %s390_s10  ;;  %p394_p1 = scmp.lt.u32.totalorder %s390_s10, %s774_s0 }
   0x4   :  { %p396_p2 = pnand %p394_p1, %p391_p0 }
   0x6   :  { %399 = shalt.err (!%p396_p2)
}
   0x7   :  { %s400_s15 = scalar_lea.vmem %s13_s7, 2048  ;;  %p405_p4 = scmp.lt.s32.totalorder %s13_s7, %s13_s7 }
   0x8   :  { %p401_p3 = scmp.ne.s32.totalorder %s13_s7, %s400_s15  ;;  %p406_p5 = scmp.lt.s32.totalorder %s400_s15, %s400_s15 }
   0xa   :  { %p407_p6 = por %p406_p5, %p405_p4 }
   0xc   :  { %p408_p7 = pnand %p407_p6, %p401_p3 }
   0xe   :  { %411 = shalt.err (!%p408_p7)
}
   0xf   :  { %s415_s16 = smov 128   ;;  %s416_s17 = smov 8  }
  0x10   :  { %18 = dma.hbm_to_vmem [thread:$0]  %s774_s0, 2048, %s13_s7, [#allocation3], %s415_s16, %s415_s16, %s416_s17  }
  0x11   :  { %412 = dma.done.wait [#allocation3], 2048  }
  0x12   :  { %413 = vsyncadd [#allocation3], 4294965248  ;;  %v30_v0 = vld [vmem:[#allocation2 + $0x40] sm:$0xff]  ;;  %v32_v1 = vld [vmem:[#allocation2 + $0x50] sm:$0xff]  ;;  %vm50_vm0 = vcmask 1043456   ;;  %vm95_vm1 = vcmask 31744  }
  0x13   :  { %v22_v2 = vld [vmem:[#allocation2] sm:$0xff]  ;;  %v41_v3 = vrot.slane %v32_v1, 4  ;;  %v115_v4 = vrot.slane %v30_v0, 4  ;;  %v24_v5 = vld [vmem:[#allocation2 + $0x10] sm:$0xff]  ;;  %v29_v18 = vld [vmem:[#allocation2 + $0x38] sm:$0xff]  ;;  %s417_s0 = smov 124  }
  0x14   :  { %v114_v6 = vrot.slane %v22_v2, 4  ;;  %v34_v7 = vld [vmem:[#allocation2 + $0x60] sm:$0xff]  ;;  %v36_v8 = vld [vmem:[#allocation2 + $0x70] sm:$0xff]  ;;  %v40_v9 = vrot.slane %v24_v5, 4  ;;  %v25_v19 = vld [vmem:[#allocation2 + $0x18] sm:$0xff]  ;;  %v193_v28 = vrot.slane %v29_v18, 4 }
  0x15   :  { %v47_v10 = vrot.slane %v36_v8, 4  ;;  %v121_v11 = vrot.slane %v34_v7, 4  ;;  %v26_v12 = vld [vmem:[#allocation2 + $0x20] sm:$0xff]  ;;  %v28_v13 = vld [vmem:[#allocation2 + $0x30] sm:$0xff]  ;;  %v443_v14 = vsel %vm50_vm0, %v30_v0, %v41_v3  ;;  %v125_v23 = vsel %vm50_vm0, %v115_v4, %v32_v1  ;;  %v27_v24 = vld [vmem:[#allocation2 + $0x28] sm:$0xff]  ;;  %s418_s23 = smov 120  }
  0x16   :  { %v46_v15 = vrot.slane %v28_v13, 4  ;;  %v120_v16 = vrot.slane %v26_v12, 4  ;;  %v446_v17 = vsel %vm50_vm0, %v114_v6, %v24_v5  ;;  %63 = vrot.lane.b32.xlu1 %v443_v14, %s417_s0  ;;  %104 = vst.msk [vmem:[%s775_s1 + $0x100] sm:$0xff] %vm95_vm1, %v443_v14  ;;  %v51_v20 = vsel %vm50_vm0, %v22_v2, %v40_v9  ;;  %v37_v25 = vld [vmem:[#allocation2 + $0x78] sm:$0xff]  ;;  %344 = vst.msk [vmem:[%s775_s1 + $0x140] sm:$0xff] %vm95_vm1, %v125_v23  ;;  %v23_v30 = vld [vmem:[#allocation2 + $0x8] sm:$0xff] }
  0x17   :  { %v54_v21 = vsel %vm50_vm0, %v34_v7, %v47_v10  ;;  %336 = vst.msk [vmem:[%s775_s1 + $0x40] sm:$0xff] %vm95_vm1, %v446_v17  ;;  %v127_v22 = vsel %vm50_vm0, %v121_v11, %v36_v8  ;;  %59 = vrot.lane.b32.xlu0 %v51_v20, %s417_s0  ;;  %96 = vst.msk [vmem:[%s775_s1] sm:$0xff] %vm95_vm1, %v51_v20  ;;  %v266_v29 = vrot.slane %v27_v24, 4  ;;  %v35_v31 = vld [vmem:[#allocation2 + $0x68] sm:$0xff]  ;;  %v33_v32 = vld [vmem:[#allocation2 + $0x58] sm:$0xff]  ;;  %v187_v33 = vrot.slane %v25_v19, 4 }
  0x18   :  { %105 = vst.msk [vmem:[%s775_s1 + $0x108] sm:$0xff] %vm95_vm1, %v54_v21  ;;  %v53_v26 = vsel %vm50_vm0, %v26_v12, %v46_v15  ;;  %v126_v27 = vsel %vm50_vm0, %v120_v16, %v28_v13  ;;  %345 = vst.msk [vmem:[%s775_s1 + $0x148] sm:$0xff] %vm95_vm1, %v127_v22  ;;  %v260_v34 = vrot.slane %v23_v30, 4  ;;  %v194_v35 = vrot.slane %v37_v25, 4  ;;  %v31_v37 = vld [vmem:[#allocation2 + $0x48] sm:$0xff]  ;;  %s419_s24 = smov 116  }
  0x19   :  { %97 = vst.msk [vmem:[%s775_s1 + $0x8] sm:$0xff] %vm95_vm1, %v53_v26  ;;  %337 = vst.msk [vmem:[%s775_s1 + $0x48] sm:$0xff] %vm95_vm1, %v126_v27  ;;  %v267_v36 = vrot.slane %v35_v31, 4  ;;  %v199_v38 = vsel %vm50_vm0, %v27_v24, %v193_v28  ;;  %v188_v39 = vrot.slane %v33_v32, 4  ;;  %v261_v40 = vrot.slane %v31_v37, 4 }
  0x1a   :  { %v272_v41 = vsel %vm50_vm0, %v266_v29, %v29_v18  ;;  %65 = vrot.lane.b32.xlu1 %v54_v21, %s417_s0  ;;  %353 = vst.msk [vmem:[%s775_s1 + $0x88] sm:$0xff] %vm95_vm1, %v199_v38  ;;  %v197_v42 = vsel %vm50_vm0, %v23_v30, %v187_v33  ;;  %v200_v43 = vsel %vm50_vm0, %v35_v31, %v194_v35 }
  0x1b   :  { %369 = vst.msk [vmem:[%s775_s1 + $0xc8] sm:$0xff] %vm95_vm1, %v272_v41  ;;  %v270_v44 = vsel %vm50_vm0, %v260_v34, %v25_v19  ;;  %v273_v45 = vsel %vm50_vm0, %v267_v36, %v37_v25  ;;  %61 = vrot.lane.b32.xlu0 %v53_v26, %s417_s0  ;;  %352 = vst.msk [vmem:[%s775_s1 + $0x80] sm:$0xff] %vm95_vm1, %v197_v42  ;;  %v198_v46 = vsel %vm50_vm0, %v31_v37, %v188_v39 }
  0x1c   :  { %361 = vst.msk [vmem:[%s775_s1 + $0x188] sm:$0xff] %vm95_vm1, %v200_v43  ;;  %368 = vst.msk [vmem:[%s775_s1 + $0xc0] sm:$0xff] %vm95_vm1, %v270_v44  ;;  %v271_v47 = vsel %vm50_vm0, %v261_v40, %v33_v32 }
  0x1d   :  { %377 = vst.msk [vmem:[%s775_s1 + $0x1c8] sm:$0xff] %vm95_vm1, %v273_v45  ;;  %360 = vst.msk [vmem:[%s775_s1 + $0x180] sm:$0xff] %vm95_vm1, %v198_v46 }
  0x1e   :  { %376 = vst.msk [vmem:[%s775_s1 + $0x1c0] sm:$0xff] %vm95_vm1, %v271_v47  ;;  %73 = vrot.lane.b32.xlu1 %v53_v26, %s418_s23 }
  0x1f   :  { %71 = vrot.lane.b32.xlu0 %v51_v20, %s418_s23 }
  0x22   :  { %77 = vrot.lane.b32.xlu1 %v54_v21, %s418_s23 }
  0x23   :  { %75 = vrot.lane.b32.xlu0 %v443_v14, %s418_s23 }
  0x26   :  { %85 = vrot.lane.b32.xlu1 %v53_v26, %s419_s24 }
  0x27   :  { %83 = vrot.lane.b32.xlu0 %v51_v20, %s419_s24 }
  0x2a   :  { %89 = vrot.lane.b32.xlu1 %v54_v21, %s419_s24 }
  0x2b   :  { %87 = vrot.lane.b32.xlu0 %v443_v14, %s419_s24 }
  0x2e   :  { %134 = vrot.lane.b32.xlu1 %v126_v27, %s417_s0 }
  0x2f   :  { %132 = vrot.lane.b32.xlu0 %v446_v17, %s417_s0 }
  0x32   :  { %138 = vrot.lane.b32.xlu1 %v127_v22, %s417_s0 }
  0x33   :  { %136 = vrot.lane.b32.xlu0 %v125_v23, %s417_s0 }
  0x36   :  { %146 = vrot.lane.b32.xlu1 %v126_v27, %s418_s23 }
  0x37   :  { %144 = vrot.lane.b32.xlu0 %v446_v17, %s418_s23 }
  0x3a   :  { %150 = vrot.lane.b32.xlu1 %v127_v22, %s418_s23 }
  0x3b   :  { %148 = vrot.lane.b32.xlu0 %v125_v23, %s418_s23 }
  0x3e   :  { %158 = vrot.lane.b32.xlu1 %v126_v27, %s419_s24 }
  0x3f   :  { %156 = vrot.lane.b32.xlu0 %v446_v17, %s419_s24 }
  0x42   :  { %162 = vrot.lane.b32.xlu1 %v127_v22, %s419_s24 }
  0x43   :  { %160 = vrot.lane.b32.xlu0 %v125_v23, %s419_s24 }
  0x46   :  { %207 = vrot.lane.b32.xlu1 %v199_v38, %s417_s0 }
  0x47   :  { %205 = vrot.lane.b32.xlu0 %v197_v42, %s417_s0 }
  0x4a   :  { %211 = vrot.lane.b32.xlu1 %v200_v43, %s417_s0 }
  0x4b   :  { %209 = vrot.lane.b32.xlu0 %v198_v46, %s417_s0 }
  0x4e   :  { %219 = vrot.lane.b32.xlu1 %v199_v38, %s418_s23 }
  0x4f   :  { %217 = vrot.lane.b32.xlu0 %v197_v42, %s418_s23 }
  0x52   :  { %223 = vrot.lane.b32.xlu1 %v200_v43, %s418_s23 }
  0x53   :  { %221 = vrot.lane.b32.xlu0 %v198_v46, %s418_s23 }
  0x56   :  { %231 = vrot.lane.b32.xlu1 %v199_v38, %s419_s24 }
  0x57   :  { %229 = vrot.lane.b32.xlu0 %v197_v42, %s419_s24 }
  0x5a   :  { %235 = vrot.lane.b32.xlu1 %v200_v43, %s419_s24 }
  0x5b   :  { %233 = vrot.lane.b32.xlu0 %v198_v46, %s419_s24 }
  0x5e   :  { %280 = vrot.lane.b32.xlu1 %v272_v41, %s417_s0 }
  0x5f   :  { %278 = vrot.lane.b32.xlu0 %v270_v44, %s417_s0 }
  0x62   :  { %284 = vrot.lane.b32.xlu1 %v273_v45, %s417_s0 }
  0x63   :  { %282 = vrot.lane.b32.xlu0 %v271_v47, %s417_s0 }
  0x66   :  { %292 = vrot.lane.b32.xlu1 %v272_v41, %s418_s23 }
  0x67   :  { %290 = vrot.lane.b32.xlu0 %v270_v44, %s418_s23 }
  0x6a   :  { %296 = vrot.lane.b32.xlu1 %v273_v45, %s418_s23 }
  0x6b   :  { %294 = vrot.lane.b32.xlu0 %v271_v47, %s418_s23 }
  0x6e   :  { %304 = vrot.lane.b32.xlu1 %v272_v41, %s419_s24 }
  0x6f   :  { %302 = vrot.lane.b32.xlu0 %v270_v44, %s419_s24 }
  0x72   :  { %308 = vrot.lane.b32.xlu1 %v273_v45, %s419_s24 }
  0x73   :  { %306 = vrot.lane.b32.xlu0 %v271_v47, %s419_s24 }
  0x88   :  { %v64_v48 = vpop.permute.xlu1 %63 }
  0x89   :  { %106 = vst.msk [vmem:[%s775_s1 + $0x110] sm:$0xff] %vm95_vm1, %v64_v48  ;;  %v60_v49 = vpop.permute.xlu0 %59 }
  0x8a   :  { %98 = vst.msk [vmem:[%s775_s1 + $0x10] sm:$0xff] %vm95_vm1, %v60_v49 }
  0x8c   :  { %v66_v50 = vpop.permute.xlu1 %65 }
  0x8d   :  { %107 = vst.msk [vmem:[%s775_s1 + $0x118] sm:$0xff] %vm95_vm1, %v66_v50  ;;  %v62_v51 = vpop.permute.xlu0 %61 }
  0x8e   :  { %99 = vst.msk [vmem:[%s775_s1 + $0x18] sm:$0xff] %vm95_vm1, %v62_v51 }
  0x90   :  { %v74_v52 = vpop.permute.xlu1 %73 }
  0x91   :  { %101 = vst.msk [vmem:[%s775_s1 + $0x28] sm:$0xff] %vm95_vm1, %v74_v52  ;;  %v72_v53 = vpop.permute.xlu0 %71 }
  0x92   :  { %100 = vst.msk [vmem:[%s775_s1 + $0x20] sm:$0xff] %vm95_vm1, %v72_v53 }
  0x94   :  { %v78_v54 = vpop.permute.xlu1 %77 }
  0x95   :  { %109 = vst.msk [vmem:[%s775_s1 + $0x128] sm:$0xff] %vm95_vm1, %v78_v54  ;;  %v76_v55 = vpop.permute.xlu0 %75 }
  0x96   :  { %108 = vst.msk [vmem:[%s775_s1 + $0x120] sm:$0xff] %vm95_vm1, %v76_v55 }
  0x98   :  { %v86_v56 = vpop.permute.xlu1 %85 }
  0x99   :  { %103 = vst.msk [vmem:[%s775_s1 + $0x38] sm:$0xff] %vm95_vm1, %v86_v56  ;;  %v84_v57 = vpop.permute.xlu0 %83 }
  0x9a   :  { %102 = vst.msk [vmem:[%s775_s1 + $0x30] sm:$0xff] %vm95_vm1, %v84_v57 }
  0x9c   :  { %v90_v58 = vpop.permute.xlu1 %89 }
  0x9d   :  { %111 = vst.msk [vmem:[%s775_s1 + $0x138] sm:$0xff] %vm95_vm1, %v90_v58  ;;  %v88_v59 = vpop.permute.xlu0 %87 }
  0x9e   :  { %110 = vst.msk [vmem:[%s775_s1 + $0x130] sm:$0xff] %vm95_vm1, %v88_v59 }
  0xa0   :  { %v135_v60 = vpop.permute.xlu1 %134 }
  0xa1   :  { %339 = vst.msk [vmem:[%s775_s1 + $0x58] sm:$0xff] %vm95_vm1, %v135_v60  ;;  %v133_v61 = vpop.permute.xlu0 %132 }
  0xa2   :  { %338 = vst.msk [vmem:[%s775_s1 + $0x50] sm:$0xff] %vm95_vm1, %v133_v61 }
  0xa4   :  { %v139_v62 = vpop.permute.xlu1 %138 }
  0xa5   :  { %347 = vst.msk [vmem:[%s775_s1 + $0x158] sm:$0xff] %vm95_vm1, %v139_v62  ;;  %v137_v63 = vpop.permute.xlu0 %136 }
  0xa6   :  { %346 = vst.msk [vmem:[%s775_s1 + $0x150] sm:$0xff] %vm95_vm1, %v137_v63 }
  0xa8   :  { %v147_v0 = vpop.permute.xlu1 %146 }
  0xa9   :  { %341 = vst.msk [vmem:[%s775_s1 + $0x68] sm:$0xff] %vm95_vm1, %v147_v0  ;;  %v145_v1 = vpop.permute.xlu0 %144 }
  0xaa   :  { %340 = vst.msk [vmem:[%s775_s1 + $0x60] sm:$0xff] %vm95_vm1, %v145_v1 }
  0xac   :  { %v151_v2 = vpop.permute.xlu1 %150 }
  0xad   :  { %349 = vst.msk [vmem:[%s775_s1 + $0x168] sm:$0xff] %vm95_vm1, %v151_v2  ;;  %v149_v3 = vpop.permute.xlu0 %148 }
  0xae   :  { %348 = vst.msk [vmem:[%s775_s1 + $0x160] sm:$0xff] %vm95_vm1, %v149_v3 }
  0xb0   :  { %v159_v4 = vpop.permute.xlu1 %158 }
  0xb1   :  { %343 = vst.msk [vmem:[%s775_s1 + $0x78] sm:$0xff] %vm95_vm1, %v159_v4  ;;  %v157_v5 = vpop.permute.xlu0 %156 }
  0xb2   :  { %342 = vst.msk [vmem:[%s775_s1 + $0x70] sm:$0xff] %vm95_vm1, %v157_v5 }
  0xb4   :  { %v163_v6 = vpop.permute.xlu1 %162 }
  0xb5   :  { %351 = vst.msk [vmem:[%s775_s1 + $0x178] sm:$0xff] %vm95_vm1, %v163_v6  ;;  %v161_v7 = vpop.permute.xlu0 %160 }
  0xb6   :  { %350 = vst.msk [vmem:[%s775_s1 + $0x170] sm:$0xff] %vm95_vm1, %v161_v7 }
  0xb8   :  { %v208_v8 = vpop.permute.xlu1 %207 }
  0xb9   :  { %355 = vst.msk [vmem:[%s775_s1 + $0x98] sm:$0xff] %vm95_vm1, %v208_v8  ;;  %v206_v9 = vpop.permute.xlu0 %205 }
  0xba   :  { %354 = vst.msk [vmem:[%s775_s1 + $0x90] sm:$0xff] %vm95_vm1, %v206_v9 }
  0xbc   :  { %v212_v10 = vpop.permute.xlu1 %211 }
  0xbd   :  { %363 = vst.msk [vmem:[%s775_s1 + $0x198] sm:$0xff] %vm95_vm1, %v212_v10  ;;  %v210_v11 = vpop.permute.xlu0 %209 }
  0xbe   :  { %362 = vst.msk [vmem:[%s775_s1 + $0x190] sm:$0xff] %vm95_vm1, %v210_v11 }
  0xc0   :  { %v220_v12 = vpop.permute.xlu1 %219 }
  0xc1   :  { %357 = vst.msk [vmem:[%s775_s1 + $0xa8] sm:$0xff] %vm95_vm1, %v220_v12  ;;  %v218_v13 = vpop.permute.xlu0 %217 }
  0xc2   :  { %356 = vst.msk [vmem:[%s775_s1 + $0xa0] sm:$0xff] %vm95_vm1, %v218_v13 }
  0xc4   :  { %v224_v14 = vpop.permute.xlu1 %223 }
  0xc5   :  { %365 = vst.msk [vmem:[%s775_s1 + $0x1a8] sm:$0xff] %vm95_vm1, %v224_v14  ;;  %v222_v15 = vpop.permute.xlu0 %221 }
  0xc6   :  { %364 = vst.msk [vmem:[%s775_s1 + $0x1a0] sm:$0xff] %vm95_vm1, %v222_v15 }
  0xc8   :  { %v232_v16 = vpop.permute.xlu1 %231 }
  0xc9   :  { %359 = vst.msk [vmem:[%s775_s1 + $0xb8] sm:$0xff] %vm95_vm1, %v232_v16  ;;  %v230_v17 = vpop.permute.xlu0 %229 }
  0xca   :  { %358 = vst.msk [vmem:[%s775_s1 + $0xb0] sm:$0xff] %vm95_vm1, %v230_v17 }
  0xcc   :  { %v236_v18 = vpop.permute.xlu1 %235 }
  0xcd   :  { %367 = vst.msk [vmem:[%s775_s1 + $0x1b8] sm:$0xff] %vm95_vm1, %v236_v18  ;;  %v234_v19 = vpop.permute.xlu0 %233 }
  0xce   :  { %366 = vst.msk [vmem:[%s775_s1 + $0x1b0] sm:$0xff] %vm95_vm1, %v234_v19 }
  0xd0   :  { %v281_v20 = vpop.permute.xlu1 %280 }
  0xd1   :  { %371 = vst.msk [vmem:[%s775_s1 + $0xd8] sm:$0xff] %vm95_vm1, %v281_v20  ;;  %v279_v21 = vpop.permute.xlu0 %278 }
  0xd2   :  { %370 = vst.msk [vmem:[%s775_s1 + $0xd0] sm:$0xff] %vm95_vm1, %v279_v21 }
  0xd4   :  { %v285_v22 = vpop.permute.xlu1 %284 }
  0xd5   :  { %379 = vst.msk [vmem:[%s775_s1 + $0x1d8] sm:$0xff] %vm95_vm1, %v285_v22  ;;  %v283_v23 = vpop.permute.xlu0 %282 }
  0xd6   :  { %378 = vst.msk [vmem:[%s775_s1 + $0x1d0] sm:$0xff] %vm95_vm1, %v283_v23 }
  0xd8   :  { %v293_v24 = vpop.permute.xlu1 %292 }
  0xd9   :  { %373 = vst.msk [vmem:[%s775_s1 + $0xe8] sm:$0xff] %vm95_vm1, %v293_v24  ;;  %v291_v25 = vpop.permute.xlu0 %290 }
  0xda   :  { %372 = vst.msk [vmem:[%s775_s1 + $0xe0] sm:$0xff] %vm95_vm1, %v291_v25 }
  0xdc   :  { %v297_v26 = vpop.permute.xlu1 %296 }
  0xdd   :  { %381 = vst.msk [vmem:[%s775_s1 + $0x1e8] sm:$0xff] %vm95_vm1, %v297_v26  ;;  %v295_v27 = vpop.permute.xlu0 %294 }
  0xde   :  { %380 = vst.msk [vmem:[%s775_s1 + $0x1e0] sm:$0xff] %vm95_vm1, %v295_v27 }
  0xe0   :  { %v305_v28 = vpop.permute.xlu1 %304 }
  0xe1   :  { %375 = vst.msk [vmem:[%s775_s1 + $0xf8] sm:$0xff] %vm95_vm1, %v305_v28  ;;  %v303_v29 = vpop.permute.xlu0 %302 }
  0xe2   :  { %374 = vst.msk [vmem:[%s775_s1 + $0xf0] sm:$0xff] %vm95_vm1, %v303_v29 }
  0xe4   :  { %v309_v30 = vpop.permute.xlu1 %308 }
  0xe5   :  { %383 = vst.msk [vmem:[%s775_s1 + $0x1f8] sm:$0xff] %vm95_vm1, %v309_v30  ;;  %v307_v31 = vpop.permute.xlu0 %306 }
  0xe6   :  { %382 = vst.msk [vmem:[%s775_s1 + $0x1f0] sm:$0xff] %vm95_vm1, %v307_v31 }
  0xe7   :  { %335 = vsyncpa [#allocation3], 1 }

</bundles_post_ra>
